<compile_context>
chip_gen: v5e
topology: v5e:2x2
jax: 0.10.0
libtpu: 0.0.40
codegen_flags: <defaults>
</compile_context>

<pallas_src>
import functools
import math

import jax
import jax.numpy as jnp
from jax.experimental import pallas as pl
from jax.experimental.pallas import tpu as pltpu


def _maxpool_stride1_kernel(edge_ref, x_ref, o_ref, *, w, ghw):
    # edge_ref: (2, GHW) int32.  row 0 == 1 at the last column of every W-row
    #           (tiled per packed plane), row 1 == 1 on the last H-row of each plane.
    # x_ref / o_ref: (TB, GHW) -- TB packed rows, each holding g flattened planes.
    x = x_ref[...]
    edge = edge_ref[...]
    last_col = edge[0:1, :] != 0          # (1, GHW), broadcasts over TB rows
    last_row = edge[1:2, :] != 0

    # Column shift (j -> j+1, clamped replicate): flat lane roll by +1; wraps
    # (end of a W-row / end of a packed plane) are masked back to x itself, so
    # m[p] = max(x[i, j], x[i, min(j+1, W-1)]).
    x_c = pltpu.roll(x, shift=ghw - 1, axis=1)          # x_c[p] = x[(p + 1) % GHW]
    m = jnp.maximum(x, jnp.where(last_col, x, x_c))

    # Row shift (i -> i+1, clamped replicate): flat lane roll by +W; the wrap on
    # the last H-row (or into the next packed plane) is masked back to m itself.
    m_r = pltpu.roll(m, shift=ghw - w, axis=1)          # m_r[p] = m[(p + W) % GHW]
    o_ref[...] = jnp.maximum(m, jnp.where(last_row, m, m_r))


def max_pool_stride1(x, *, target_block_bytes=4 * 1024 * 1024,
                     vmem_limit_bytes=48 * 1024 * 1024):
    """x: (N, C, H, W) -> (N, C, H, W); replicate-pad right/bottom, 2x2 max, stride 1."""
    N, C, H, W = x.shape
    NC = N * C
    HW = H * W
    itemsize = x.dtype.itemsize

    # --- pack planes so the lane dim is a multiple of 128 (unmasked vst) -----
    g = 128 // math.gcd(HW, 128)          # smallest g with (g*HW) % 128 == 0
    if NC % g != 0:
        g = 1  # TODO(synk): pad a few planes when NC % g != 0 instead of falling
               # back to masked partial stores for lane-ragged HW.
    rows = NC // g
    ghw = g * HW
    row_bytes = ghw * itemsize

    # --- choose how many packed rows each grid step processes ----------------
    # VMEM footprint ~= 7x block (in+out double buffers = 4x, roll/where temps
    # ~= 3x); keep comfortably under vmem_limit_bytes.
    block_bytes = min(target_block_bytes, vmem_limit_bytes // 8)
    tb = max(1, block_bytes // row_bytes)
    gran = max(1, 32 // itemsize)         # sublane packing: 8 f32 / 16 bf16 / 32 int8
    if rows >= 2 * gran:
        # keep >= 2 grid steps so both v7x TensorCores get work.
        tb = min(tb, pl.cdiv(rows, 2))
    tb = min(tb, rows)
    if tb < rows:
        tb = max(gran, (tb // gran) * gran)
    grid = pl.cdiv(rows, tb)              # ragged last block handled by Pallas
    # TODO(synk): for very large planes (e.g. 608x608) even tb == gran overflows the
    # VMEM budget; split H across a second grid axis with a one-row halo instead.

    x_flat = x.reshape(rows, ghw)         # no host-side padding / output slicing

    # Tiny static edge masks (grid-invariant input, stays resident in VMEM).
    lanes = jnp.arange(ghw, dtype=jnp.int32)
    in_plane = lanes % HW
    last_col = (in_plane % W == W - 1).astype(jnp.int32)
    last_row = (in_plane >= (H - 1) * W).astype(jnp.int32)
    edge = jnp.stack([last_col, last_row], axis=0)      # (2, GHW) int32

    kernel = functools.partial(_maxpool_stride1_kernel, w=W, ghw=ghw)

    out_flat = pl.pallas_call(
        kernel,
        out_shape=jax.ShapeDtypeStruct((rows, ghw), x.dtype),
        grid_spec=pltpu.PrefetchScalarGridSpec(
            num_scalar_prefetch=0,
            grid=(grid,),
            in_specs=[
                pl.BlockSpec((2, ghw), lambda i: (0, 0)),    # edge masks (invariant)
                pl.BlockSpec((tb, ghw), lambda i: (i, 0)),   # packed input planes
            ],
            out_specs=pl.BlockSpec((tb, ghw), lambda i: (i, 0)),
        ),
        compiler_params=pltpu.CompilerParams(
            dimension_semantics=("parallel",),
            vmem_limit_bytes=vmem_limit_bytes),
        cost_estimate=pl.CostEstimate(
            flops=3 * rows * ghw,
            transcendentals=0,
            bytes_accessed=2 * rows * ghw * itemsize),
    )(edge, x_flat)

    return out_flat.reshape(N, C, H, W)


def _reference(x):
    # Pure-JAX reference: replicate pad (right, bottom) then 2x2 max pool stride 1.
    xp = jnp.pad(x, ((0, 0), (0, 0), (0, 1), (0, 1)), mode="edge")
    return jax.lax.reduce_window(
        xp, -jnp.inf, jax.lax.max,
        window_dimensions=(1, 1, 2, 2),
        window_strides=(1, 1, 1, 1),
        padding="VALID",
    )


if __name__ == "__main__":
    key = jax.random.PRNGKey(0)
    N, C, H, W = 2, 4, 16, 16
    x = jax.random.normal(key, (N, C, H, W), dtype=jnp.float32)

    out = max_pool_stride1(x)
    jax.block_until_ready(out)

    ref = _reference(x)
    assert out.shape == (N, C, H, W)
    assert jnp.allclose(out, ref), "mismatch vs reference"

    print("KERNEL_OK")
</pallas_src>

<mosaic_0001>
module attributes {stable_mosaic.version = 11 : i64} {
  func.func @_maxpool_stride1_kernel(%arg0: i32, %arg1: memref<2x256xi32, #tpu.memory_space<vmem>>, %arg2: memref<8x256xf32, #tpu.memory_space<vmem>>, %arg3: memref<8x256xf32, #tpu.memory_space<vmem>>) attributes {dimension_semantics = [#tpu.dimension_semantics<parallel>], iteration_bounds = array<i64: 1>, scalar_prefetch = 0 : i64, scratch_operands = 0 : i64, tpu.core_type = #tpu.core_type<tc>, window_params = [{pipeline_mode = #tpu.pipeline_mode<synchronous>, transform_indices = @transform_0, window_bounds = array<i64: 2, 256>}, {transform_indices = @transform_1, window_bounds = array<i64: 8, 256>}, {transform_indices = @transform_2, window_bounds = array<i64: 8, 256>}]} {
    %c0 = arith.constant 0 : index
    %c0_0 = arith.constant 0 : index
    %0 = vector.load %arg2[%c0, %c0_0] : memref<8x256xf32, #tpu.memory_space<vmem>>, vector<8x256xf32>
    %c0_1 = arith.constant 0 : index
    %c0_2 = arith.constant 0 : index
    %1 = vector.load %arg1[%c0_1, %c0_2] : memref<2x256xi32, #tpu.memory_space<vmem>>, vector<2x256xi32>
    %2 = vector.extract_strided_slice %1 {offsets = [0, 0], sizes = [1, 256], strides = [1, 1]} : vector<2x256xi32> to vector<1x256xi32>
    %c0_i32 = arith.constant 0 : i32
    %3 = vector.broadcast %c0_i32 : i32 to vector<1x256xi32>
    %4 = arith.cmpi ne, %2, %3 : vector<1x256xi32>
    %5 = vector.extract_strided_slice %1 {offsets = [1, 0], sizes = [1, 256], strides = [1, 1]} : vector<2x256xi32> to vector<1x256xi32>
    %c0_i32_3 = arith.constant 0 : i32
    %6 = vector.broadcast %c0_i32_3 : i32 to vector<1x256xi32>
    %7 = arith.cmpi ne, %5, %6 : vector<1x256xi32>
    %c255_i32 = arith.constant 255 : i32
    %8 = tpu.dynamic_rotate %0 by %c255_i32 dim 1 : vector<8x256xf32>, i32 -> vector<8x256xf32>
    %9 = vector.shape_cast %4 : vector<1x256xi1> to vector<1x256xi1>
    %10 = vector.broadcast %9 : vector<1x256xi1> to vector<8x256xi1>
    %11 = arith.select %10, %0, %8 : vector<8x256xi1>, vector<8x256xf32>
    %12 = arith.maximumf %0, %11 : vector<8x256xf32>
    %c240_i32 = arith.constant 240 : i32
    %13 = tpu.dynamic_rotate %12 by %c240_i32 dim 1 : vector<8x256xf32>, i32 -> vector<8x256xf32>
    %14 = vector.shape_cast %7 : vector<1x256xi1> to vector<1x256xi1>
    %15 = vector.broadcast %14 : vector<1x256xi1> to vector<8x256xi1>
    %16 = arith.select %15, %12, %13 : vector<8x256xi1>, vector<8x256xf32>
    %17 = arith.maximumf %12, %16 : vector<8x256xf32>
    %c0_4 = arith.constant 0 : index
    %c0_5 = arith.constant 0 : index
    %18 = vector.load %arg3[%c0_4, %c0_5] : memref<8x256xf32, #tpu.memory_space<vmem>>, vector<8x256xf32>
    tpu.vector_store %arg3[%c0_4, %c0_5], %17 {strides = array<i32>} : memref<8x256xf32, #tpu.memory_space<vmem>>, vector<8x256xf32>,
    return
  }
  func.func @transform_0(%arg0: i32) -> (i32, i32) {
    %c0_i32 = arith.constant 0 : i32
    %c0_i32_0 = arith.constant 0 : i32
    %c0_i32_1 = arith.constant 0 : i32
    return %c0_i32, %c0_i32_0 : i32, i32
  }
  func.func @transform_1(%arg0: i32) -> (i32, i32) {
    %c0_i32 = arith.constant 0 : i32
    %c0_i32_0 = arith.constant 0 : i32
    return %arg0, %c0_i32 : i32, i32
  }
  func.func @transform_2(%arg0: i32) -> (i32, i32) {
    %c0_i32 = arith.constant 0 : i32
    %c0_i32_0 = arith.constant 0 : i32
    return %arg0, %c0_i32 : i32, i32
  }
}

</mosaic_0001>

<bundles_post_ra>
// kernel: tpu_custom_call.1
= control target key start
LH: loop header
LB: loop body
LE: loop exit
PB: predicated region body
PF: predicated region fallthrough
CT: control target
= control target key end

     0   :  { %7 = vsyncpa [#allocation3], 0  ;;  %s215_s0 = inlined_call_operand.hbm [shape: s32[2,256], index: 0, kind: input, shape index: {}]   ;;  %s216_s1 = inlined_call_operand.hbm [shape: f32[8,256], index: 1, kind: input, shape index: {}]   ;;  %s217_s2 = inlined_call_operand.hbm [shape: f32[8,256], index: 2, kind: output, shape index: {}]  }
   0x1   :  { %8 = vsyncpa [#allocation6], 0 }
   0x2   :  { %9 = vsyncpa [#allocation4], 0  ;;  %s15_s11 = sshll.u32 %s215_s0, 4  ;;  %s185_s12 = smov [#allocation2]   ;;  %s16_s11 = int_to_ptr.hbm [resolvable:$true] %s15_s11 }
   0x3   :  { %s17_s13 = sshll.u32 %s185_s12, 4  ;;  %s26_s16 = sshll.u32 %s216_s1, 4  ;;  %s18_s13 = int_to_ptr.vmem [resolvable:$true] %s17_s13  ;;  %s27_s16 = int_to_ptr.hbm [resolvable:$true] %s26_s16 }
   0x4   :  { %20 = dma.hbm_to_vmem [thread:$0]  %s16_s11, 64, %s18_s13, [#allocation3]  }
   0x5   :  { %s186_s17 = smov [#allocation5]  }
   0x6   :  { %s28_s18 = sshll.u32 %s186_s17, 4  ;;  %s29_s18 = int_to_ptr.vmem [resolvable:$true] %s28_s18 }
   0x7   :  { %31 = dma.hbm_to_vmem [thread:$0]  %s27_s16, 256, %s29_s18, [#allocation6]  }
   0x8   :  { %179 = dma.done.wait [#allocation3], 64  }
   0x9   :  { %180 = vsyncadd [#allocation3], 4294967232 }
   0xa   :  { %181 = dma.done.wait [#allocation6], 256  }
   0xb   :  { %182 = vsyncadd [#allocation6], 4294967040  ;;  %v40_v0 = vld [vmem:[#allocation5] sm:$0xff]  ;;  %s187_s0 = smov 127   ;;  %v41_v1 = vld [vmem:[#allocation5 + $0x8] sm:$0xff]  ;;  %v188_v3 = vmov 0   ;;  %v48_v5 = vlaneseq }
   0xc   :  { %44 = vrot.lane.b32.xlu0 %v40_v0, %s187_s0  ;;  %v42_v2 = vld [vmem:[#allocation2] sm:$0xf]  ;;  %s189_s1 = smov 112   ;;  %s190_s19 = smov [#allocation7]  }
   0xd   :  { %vm43_vm0 = vcmp.ne.s32.totalorder %v42_v2, 0  ;;  %v49_v8 = vand.u32 127, %v48_v5  ;;  %s88_s20 = sshll.u32 %s190_s19, 4  ;;  %s90_s23 = sshll.u32 %s217_s2, 4  ;;  %s89_s20 = int_to_ptr.vmem [resolvable:$true] %s88_s20  ;;  %s91_s23 = int_to_ptr.hbm [resolvable:$true] %s90_s23 }
   0xe   :  { %v53_v4 = vsel %vm43_vm0, 1, %v188_v3 }
   0xf   :  { %v54_v6 = vperm.slane %v53_v4, 0  ;;  %v55_v10 = vperm.slane %v53_v4, 2  ;;  %vm50_vm1 = vcmp.lt.s32.totalorder %v49_v8, 127  ;;  %v71_v19 = vperm.slane %v53_v4, 1 }
  0x10   :  { %v72_v20 = vperm.slane %v53_v4, 3  ;;  %vm68_vm4 = vcmp.lt.s32.totalorder %v49_v8, 112 }
  0x11   :  { %v56_v9 = vperm.slane %v54_v6, 0  ;;  %v57_v12 = vperm.slane %v55_v10, 0  ;;  %v73_v22 = vperm.slane %v71_v19, 1 }
  0x12   :  { %v74_v23 = vperm.slane %v72_v20, 1 }
  0x13   :  { %vm58_vm2 = vcmp.eq.s32.totalorder %v56_v9, 1  ;;  %vm59_vm3 = vcmp.eq.s32.totalorder %v57_v12, 1  ;;  %vm75_vm5 = vcmp.eq.s32.totalorder %v73_v22, 1 }
  0x14   :  { %46 = vrot.lane.b32.xlu0 %v41_v1, %s187_s0  ;;  %vm76_vm6 = vcmp.eq.s32.totalorder %v74_v23, 1 }
  0x7e   :  { %v45_v7 = vpop.permute.xlu0 %44 }
  0x86   :  { %v47_v11 = vpop.permute.xlu0 %46 }
  0x87   :  { %v51_v13 = vsel %vm50_vm1, %v45_v7, %v47_v11  ;;  %v52_v16 = vsel %vm50_vm1, %v47_v11, %v45_v7 }
  0x88   :  { %v60_v14 = vsel %vm58_vm2, %v40_v0, %v51_v13  ;;  %v61_v17 = vsel %vm59_vm3, %v41_v1, %v52_v16 }
  0x89   :  { %v62_v15 = vmax.f32 %v40_v0, %v60_v14  ;;  %v63_v18 = vmax.f32 %v41_v1, %v61_v17 }
  0x8b   :  { %64 = vrot.lane.b32.xlu1 %v62_v15, %s189_s1 }
  0x93   :  { %66 = vrot.lane.b32.xlu1 %v63_v18, %s189_s1 }
  0xfd   :  { %v65_v21 = vpop.permute.xlu1 %64 }
 0x105   :  { %v67_v24 = vpop.permute.xlu1 %66 }
 0x106   :  { %v69_v25 = vsel %vm68_vm4, %v65_v21, %v67_v24  ;;  %v70_v26 = vsel %vm68_vm4, %v67_v24, %v65_v21 }
 0x107   :  { %v77_v27 = vsel %vm75_vm5, %v62_v15, %v69_v25  ;;  %v78_v28 = vsel %vm76_vm6, %v63_v18, %v70_v26 }
 0x108   :  { %v79_v29 = vmax.f32 %v62_v15, %v77_v27  ;;  %v80_v30 = vmax.f32 %v63_v18, %v78_v28 }
 0x10a   :  { %81 = vst [vmem:[#allocation7] sm:$0xff] %v79_v29 }
 0x10b   :  { %82 = vst [vmem:[#allocation7 + $0x8] sm:$0xff] %v80_v30 }
 0x10c   :  { %93 = dma.vmem_to_hbm [thread:$0]  %s89_s20, 256, %s91_s23, [#allocation4]  }
 0x10d   :  { %183 = dma.done.wait [#allocation4], 256  }
 0x10e   :  { %184 = vsyncadd [#allocation4], 4294967040 }
 0x10f   :  { %98 = vsyncpa [#allocation3], 1 }
 0x110   :  { %99 = vsyncpa [#allocation6], 1 }
 0x111   :  { %100 = vsyncpa [#allocation4], 1 }

</bundles_post_ra>
